<compile_context>
chip_gen: v7x
topology: tpu7x:2x2x1
jax: 0.10.0
libtpu: 0.0.40
codegen_flags: <defaults>
</compile_context>

<pallas_src>
import math
import functools

import jax
import jax.numpy as jnp
from jax.experimental import pallas as pl
from jax.experimental.pallas import tpu as pltpu

X_DIM = 64
Y_DIM = 512
LN_EPS = 1e-5
GELU_C = math.sqrt(2.0 / math.pi)


def _encoder_kernel(x_ref, w1_ref, b1_ref, w2_ref, b2_ref, g_ref, be_ref,
                    o_ref, *, gelu_in_bf16):
    # --- Linear1 on the MXU: bf16 operands, f32 accumulation ---
    x_bf = x_ref[...].astype(jnp.bfloat16)
    h = jnp.dot(x_bf, w1_ref[...], preferred_element_type=jnp.float32)
    h = h + b1_ref[...]                          # (tm, 512) + (1, 512)

    # --- tanh-approx GELU (matches the torch GELU module) ---
    if gelu_in_bf16:
        # v6e/v7x: bf16 VPU/EUP -> half the VALU slots for the polynomial; the
        # result feeds the bf16 MXU operand of Linear2 directly.
        hb = h.astype(jnp.bfloat16)
        g = 0.5 * hb * (1.0 + jnp.tanh(GELU_C * (hb + 0.044715 * hb * hb * hb)))
        g_bf = g
    else:
        # v5e (no bf16 VPU/EUP): keep the chain in f32.
        g = 0.5 * h * (1.0 + jnp.tanh(GELU_C * (h + 0.044715 * h * h * h)))
        g_bf = g.astype(jnp.bfloat16)

    # --- Linear2 on the MXU: bf16 operands, f32 accumulation ---
    z = jnp.dot(g_bf, w2_ref[...], preferred_element_type=jnp.float32)
    z = z + b2_ref[...]

    # --- LayerNorm over last dim (biased variance, eps=1e-5), all f32 ---
    mean = jnp.mean(z, axis=-1, keepdims=True)
    zc = z - mean
    var = jnp.mean(zc * zc, axis=-1, keepdims=True)
    y = zc * jax.lax.rsqrt(var + LN_EPS) * g_ref[...] + be_ref[...]

    # --- Dropout: identity (eval mode) ---
    o_ref[...] = y.astype(o_ref.dtype)


def _round_up(n, m):
    return (n + m - 1) // m * m


def prepare_params(w1, b1, w2, b2, gamma, beta):
    """One-time parameter prep (outside the per-call hot path): bf16 weights
    for the MXU, f32 biases / LayerNorm params."""
    return (jnp.asarray(w1, jnp.bfloat16), jnp.asarray(b1, jnp.float32),
            jnp.asarray(w2, jnp.bfloat16), jnp.asarray(b2, jnp.float32),
            jnp.asarray(gamma, jnp.float32), jnp.asarray(beta, jnp.float32))


def _use_bf16_elementwise():
    # bf16 VPU/EUP exist on v6e and later; keep f32 elementwise on v5e/older.
    try:
        kind = jax.devices()[0].device_kind.lower()
    except Exception:
        return False
    return ("v6" in kind) or ("v7" in kind)


@functools.partial(jax.jit, static_argnames=("tm", "gelu_in_bf16"))
def simple_fc_encoder(x, w1_bf, b1, w2_bf, b2, gamma, beta, *, tm=256,
                      gelu_in_bf16=False):
    B, xd = x.shape
    yd = w1_bf.shape[1]

    # Row tile: large enough to amortize per-step overhead, but always >= 2
    # grid steps once B >= 16 (keeps both v7x TensorCores busy and gives the
    # pipeline something to overlap writeback/prefetch with).
    if B >= 16:
        tm_eff = min(tm, _round_up(pl.cdiv(B, 2), 8))
    else:
        tm_eff = min(tm, _round_up(B, 8))
    Bp = _round_up(B, tm_eff)

    # Only materialize a padded copy when the batch is ragged.
    x_in = x if Bp == B else jnp.zeros((Bp, xd), x.dtype).at[:B, :].set(x)

    grid = (Bp // tm_eff,)

    def const2d(arr):
        # Grid-invariant operand: constant index_map -> single buffer.
        return pl.BlockSpec(arr.shape, lambda i: (0, 0),
                            pipeline_mode=pl.Buffered(1))

    flops = 2 * Bp * (xd * yd + yd * yd)
    transcendentals = Bp * yd                                # tanh in GELU
    bytes_accessed = (x_in.size * x_in.dtype.itemsize
                      + w1_bf.size * 2 + w2_bf.size * 2
                      + (b1.size + b2.size + gamma.size + beta.size) * 4
                      + Bp * yd * 4)

    kernel = functools.partial(_encoder_kernel, gelu_in_bf16=gelu_in_bf16)

    out = pl.pallas_call(
        kernel,
        out_shape=jax.ShapeDtypeStruct((Bp, yd), x.dtype),
        grid_spec=pltpu.PrefetchScalarGridSpec(
            num_scalar_prefetch=0,
            grid=grid,
            in_specs=[
                pl.BlockSpec((tm_eff, xd), lambda i: (i, 0)),  # x tile (tm, 64)
                const2d(w1_bf),   # W1 (64, 512)  bf16
                const2d(b1),      # b1 (1, 512)   f32
                const2d(w2_bf),   # W2 (512, 512) bf16
                const2d(b2),      # b2 (1, 512)   f32
                const2d(gamma),   # LN gamma (1, 512) f32
                const2d(beta),    # LN beta  (1, 512) f32
            ],
            out_specs=pl.BlockSpec((tm_eff, yd), lambda i: (i, 0)),
        ),
        compiler_params=pltpu.CompilerParams(
            dimension_semantics=("parallel",)),
        cost_estimate=pl.CostEstimate(
            flops=flops,
            transcendentals=transcendentals,
            bytes_accessed=bytes_accessed),
    )(x_in, w1_bf, b1, w2_bf, b2, gamma, beta)

    return out if Bp == B else out[:B]


def _reference(x, w1, b1, w2, b2, gamma, beta):
    h = x @ w1 + b1
    h = 0.5 * h * (1.0 + jnp.tanh(GELU_C * (h + 0.044715 * h ** 3)))
    z = h @ w2 + b2
    mean = jnp.mean(z, axis=-1, keepdims=True)
    var = jnp.mean((z - mean) ** 2, axis=-1, keepdims=True)
    return (z - mean) * jax.lax.rsqrt(var + LN_EPS) * gamma + beta


if __name__ == "__main__":
    key = jax.random.PRNGKey(0)
    k_x, k_w1, k_b1, k_w2, k_b2 = jax.random.split(key, 5)

    # Small batch; x_dim/y_dim fixed by the module (64 -> 512).
    B = 32
    x = jax.random.normal(k_x, (B, X_DIM), dtype=jnp.float32)

    # Deterministic parameter init (shapes from nn.Linear / nn.LayerNorm),
    # stored as (in, out) = torch weight transposed.
    lim1 = 1.0 / math.sqrt(X_DIM)
    lim2 = 1.0 / math.sqrt(Y_DIM)
    w1 = jax.random.uniform(k_w1, (X_DIM, Y_DIM), jnp.float32, -lim1, lim1)
    b1 = jax.random.uniform(k_b1, (1, Y_DIM), jnp.float32, -lim1, lim1)
    w2 = jax.random.uniform(k_w2, (Y_DIM, Y_DIM), jnp.float32, -lim2, lim2)
    b2 = jax.random.uniform(k_b2, (1, Y_DIM), jnp.float32, -lim2, lim2)
    gamma = jnp.ones((1, Y_DIM), jnp.float32)    # LayerNorm weight init
    beta = jnp.zeros((1, Y_DIM), jnp.float32)    # LayerNorm bias init

    # One-time weight prep (bf16 MXU operands) outside the hot path.
    params = prepare_params(w1, b1, w2, b2, gamma, beta)

    out = simple_fc_encoder(x, *params, tm=256,
                            gelu_in_bf16=_use_bf16_elementwise())
    out = jax.block_until_ready(out)

    ref = _reference(x, w1, b1, w2, b2, gamma, beta)
    assert out.shape == (B, Y_DIM)
    # bf16 MXU operands (f32 accumulation) and bf16 GELU on v6e/v7x -> looser
    # tolerance than pure f32; LayerNorm renormalizes so the drift stays small.
    assert jnp.allclose(out, ref, atol=5e-2, rtol=5e-2), "mismatch vs reference"

    print("KERNEL_OK")
</pallas_src>

<mosaic_0001>
module attributes {stable_mosaic.version = 11 : i64} {
  func.func @_encoder_kernel(%arg0: i32, %arg1: memref<16x64xf32, #tpu.memory_space<vmem>>, %arg2: memref<64x512xbf16, #tpu.memory_space<vmem>>, %arg3: memref<1x512xf32, #tpu.memory_space<vmem>>, %arg4: memref<512x512xbf16, #tpu.memory_space<vmem>>, %arg5: memref<1x512xf32, #tpu.memory_space<vmem>>, %arg6: memref<1x512xf32, #tpu.memory_space<vmem>>, %arg7: memref<1x512xf32, #tpu.memory_space<vmem>>, %arg8: memref<16x512xf32, #tpu.memory_space<vmem>>) attributes {dimension_semantics = [#tpu.dimension_semantics<parallel>], iteration_bounds = array<i64: 2>, scalar_prefetch = 0 : i64, scratch_operands = 0 : i64, tpu.core_type = #tpu.core_type<tc>, window_params = [{transform_indices = @transform_0, window_bounds = array<i64: 16, 64>}, {pipeline_mode = #tpu.pipeline_mode<synchronous>, transform_indices = @transform_1, window_bounds = array<i64: 64, 512>}, {pipeline_mode = #tpu.pipeline_mode<synchronous>, transform_indices = @transform_2, window_bounds = array<i64: 1, 512>}, {pipeline_mode = #tpu.pipeline_mode<synchronous>, transform_indices = @transform_3, window_bounds = array<i64: 512, 512>}, {pipeline_mode = #tpu.pipeline_mode<synchronous>, transform_indices = @transform_4, window_bounds = array<i64: 1, 512>}, {pipeline_mode = #tpu.pipeline_mode<synchronous>, transform_indices = @transform_5, window_bounds = array<i64: 1, 512>}, {pipeline_mode = #tpu.pipeline_mode<synchronous>, transform_indices = @transform_6, window_bounds = array<i64: 1, 512>}, {transform_indices = @transform_7, window_bounds = array<i64: 16, 512>}]} {
    %c0 = arith.constant 0 : index
    %c0_0 = arith.constant 0 : index
    %0 = vector.load %arg1[%c0, %c0_0] : memref<16x64xf32, #tpu.memory_space<vmem>>, vector<16x64xf32>
    %1 = arith.truncf %0 : vector<16x64xf32> to vector<16x64xbf16>
    %c0_1 = arith.constant 0 : index
    %c0_2 = arith.constant 0 : index
    %2 = vector.load %arg2[%c0_1, %c0_2] : memref<64x512xbf16, #tpu.memory_space<vmem>>, vector<64x512xbf16>
    %cst = arith.constant dense<0.000000e+00> : vector<16x512xf32>
    %3 = tpu.matmul %1, %2, %cst {dimension_numbers = #tpu.dot_dimension_numbers<[1], [0], [0], [1], [0, 0, 1, 1], [], []>} : vector<16x64xbf16>, vector<64x512xbf16>, vector<16x512xf32> -> vector<16x512xf32>
    %c0_3 = arith.constant 0 : index
    %c0_4 = arith.constant 0 : index
    %4 = vector.load %arg3[%c0_3, %c0_4] : memref<1x512xf32, #tpu.memory_space<vmem>>, vector<1x512xf32>
    %5 = vector.broadcast %4 : vector<1x512xf32> to vector<16x512xf32>
    %6 = arith.addf %3, %5 : vector<16x512xf32>
    %cst_5 = arith.constant 5.000000e-01 : f32
    %7 = vector.broadcast %cst_5 : f32 to vector<16x512xf32>
    %8 = arith.mulf %7, %6 : vector<16x512xf32>
    %cst_6 = arith.constant 4.471500e-02 : f32
    %9 = vector.broadcast %cst_6 : f32 to vector<16x512xf32>
    %10 = arith.mulf %9, %6 : vector<16x512xf32>
    %11 = arith.mulf %10, %6 : vector<16x512xf32>
    %12 = arith.mulf %11, %6 : vector<16x512xf32>
    %13 = arith.addf %6, %12 : vector<16x512xf32>
    %cst_7 = arith.constant 0.797884583 : f32
    %14 = vector.broadcast %cst_7 : f32 to vector<16x512xf32>
    %15 = arith.mulf %14, %13 : vector<16x512xf32>
    %16 = math.tanh %15 : vector<16x512xf32>
    %cst_8 = arith.constant 1.000000e+00 : f32
    %17 = vector.broadcast %cst_8 : f32 to vector<16x512xf32>
    %18 = arith.addf %17, %16 : vector<16x512xf32>
    %19 = arith.mulf %8, %18 : vector<16x512xf32>
    %20 = arith.truncf %19 : vector<16x512xf32> to vector<16x512xbf16>
    %c0_9 = arith.constant 0 : index
    %c0_10 = arith.constant 0 : index
    %21 = vector.load %arg4[%c0_9, %c0_10] : memref<512x512xbf16, #tpu.memory_space<vmem>>, vector<512x512xbf16>
    %cst_11 = arith.constant dense<0.000000e+00> : vector<16x512xf32>
    %22 = tpu.matmul %20, %21, %cst_11 {dimension_numbers = #tpu.dot_dimension_numbers<[1], [0], [0], [1], [0, 0, 1, 1], [], []>} : vector<16x512xbf16>, vector<512x512xbf16>, vector<16x512xf32> -> vector<16x512xf32>
    %c0_12 = arith.constant 0 : index
    %c0_13 = arith.constant 0 : index
    %23 = vector.load %arg5[%c0_12, %c0_13] : memref<1x512xf32, #tpu.memory_space<vmem>>, vector<1x512xf32>
    %24 = vector.broadcast %23 : vector<1x512xf32> to vector<16x512xf32>
    %25 = arith.addf %22, %24 : vector<16x512xf32>
    %cst_14 = arith.constant dense<0.000000e+00> : vector<16xf32>
    %26 = vector.multi_reduction <add>, %25, %cst_14 [1] : vector<16x512xf32> to vector<16xf32>
    %27 = vector.shape_cast %26 : vector<16xf32> to vector<16x1xf32>
    %cst_15 = arith.constant 5.120000e+02 : f32
    %28 = vector.broadcast %cst_15 : f32 to vector<16x1xf32>
    %29 = arith.divf %27, %28 : vector<16x1xf32>
    %30 = vector.broadcast %29 : vector<16x1xf32> to vector<16x512xf32>
    %31 = arith.subf %25, %30 : vector<16x512xf32>
    %32 = arith.mulf %31, %31 : vector<16x512xf32>
    %cst_16 = arith.constant dense<0.000000e+00> : vector<16xf32>
    %33 = vector.multi_reduction <add>, %32, %cst_16 [1] : vector<16x512xf32> to vector<16xf32>
    %34 = vector.shape_cast %33 : vector<16xf32> to vector<16x1xf32>
    %cst_17 = arith.constant 5.120000e+02 : f32
    %35 = vector.broadcast %cst_17 : f32 to vector<16x1xf32>
    %36 = arith.divf %34, %35 : vector<16x1xf32>
    %cst_18 = arith.constant 9.99999974E-6 : f32
    %37 = vector.broadcast %cst_18 : f32 to vector<16x1xf32>
    %38 = arith.addf %36, %37 : vector<16x1xf32>
    %39 = math.rsqrt %38 : vector<16x1xf32>
    %40 = vector.broadcast %39 : vector<16x1xf32> to vector<16x512xf32>
    %41 = arith.mulf %31, %40 : vector<16x512xf32>
    %c0_19 = arith.constant 0 : index
    %c0_20 = arith.constant 0 : index
    %42 = vector.load %arg6[%c0_19, %c0_20] : memref<1x512xf32, #tpu.memory_space<vmem>>, vector<1x512xf32>
    %43 = vector.broadcast %42 : vector<1x512xf32> to vector<16x512xf32>
    %44 = arith.mulf %41, %43 : vector<16x512xf32>
    %c0_21 = arith.constant 0 : index
    %c0_22 = arith.constant 0 : index
    %45 = vector.load %arg7[%c0_21, %c0_22] : memref<1x512xf32, #tpu.memory_space<vmem>>, vector<1x512xf32>
    %46 = vector.broadcast %45 : vector<1x512xf32> to vector<16x512xf32>
    %47 = arith.addf %44, %46 : vector<16x512xf32>
    %c0_23 = arith.constant 0 : index
    %c0_24 = arith.constant 0 : index
    %48 = vector.load %arg8[%c0_23, %c0_24] : memref<16x512xf32, #tpu.memory_space<vmem>>, vector<16x512xf32>
    tpu.vector_store %arg8[%c0_23, %c0_24], %47 {strides = array<i32>} : memref<16x512xf32, #tpu.memory_space<vmem>>, vector<16x512xf32>,
    return
  }
  func.func @transform_0(%arg0: i32) -> (i32, i32) {
    %c0_i32 = arith.constant 0 : i32
    %c0_i32_0 = arith.constant 0 : i32
    return %arg0, %c0_i32 : i32, i32
  }
  func.func @transform_1(%arg0: i32) -> (i32, i32) {
    %c0_i32 = arith.constant 0 : i32
    %c0_i32_0 = arith.constant 0 : i32
    %c0_i32_1 = arith.constant 0 : i32
    return %c0_i32, %c0_i32_0 : i32, i32
  }
  func.func @transform_2(%arg0: i32) -> (i32, i32) {
    %c0_i32 = arith.constant 0 : i32
    %c0_i32_0 = arith.constant 0 : i32
    %c0_i32_1 = arith.constant 0 : i32
    return %c0_i32, %c0_i32_0 : i32, i32
  }
  func.func @transform_3(%arg0: i32) -> (i32, i32) {
    %c0_i32 = arith.constant 0 : i32
    %c0_i32_0 = arith.constant 0 : i32
    %c0_i32_1 = arith.constant 0 : i32
    return %c0_i32, %c0_i32_0 : i32, i32
  }
  func.func @transform_4(%arg0: i32) -> (i32, i32) {
    %c0_i32 = arith.constant 0 : i32
    %c0_i32_0 = arith.constant 0 : i32
    %c0_i32_1 = arith.constant 0 : i32
    return %c0_i32, %c0_i32_0 : i32, i32
  }
  func.func @transform_5(%arg0: i32) -> (i32, i32) {
    %c0_i32 = arith.constant 0 : i32
    %c0_i32_0 = arith.constant 0 : i32
    %c0_i32_1 = arith.constant 0 : i32
    return %c0_i32, %c0_i32_0 : i32, i32
  }
  func.func @transform_6(%arg0: i32) -> (i32, i32) {
    %c0_i32 = arith.constant 0 : i32
    %c0_i32_0 = arith.constant 0 : i32
    %c0_i32_1 = arith.constant 0 : i32
    return %c0_i32, %c0_i32_0 : i32, i32
  }
  func.func @transform_7(%arg0: i32) -> (i32, i32) {
    %c0_i32 = arith.constant 0 : i32
    %c0_i32_0 = arith.constant 0 : i32
    return %arg0, %c0_i32 : i32, i32
  }
}

</mosaic_0001>

<bundles_post_ra>
// kernel: simple_fc_encoder.1
= control target key start
LH: loop header
LB: loop body
LE: loop exit
PB: predicated region body
PF: predicated region fallthrough
CT: control target
= control target key end

     0   :  { %12 = vsyncpa [#allocation3], 0  ;;  %s2818_s0 = inlined_call_operand.hbm [shape: f32[32,64], index: 0, kind: input, shape index: {}]   ;;  %s2819_s1 = inlined_call_operand.hbm [shape: bf16[64,512], index: 1, kind: input, shape index: {}]   ;;  %s2820_s2 = inlined_call_operand.vmem [shape: f32[1,512], index: 2, kind: input, shape index: {}]   ;;  %s2821_s3 = inlined_call_operand.hbm [shape: bf16[512,512], index: 3, kind: input, shape index: {}]   ;;  %s2822_s4 = inlined_call_operand.vmem [shape: f32[1,512], index: 4, kind: input, shape index: {}]   ;;  %s2823_s5 = inlined_call_operand.vmem [shape: f32[1,512], index: 5, kind: input, shape index: {}]   ;;  %s2824_s6 = inlined_call_operand.vmem [shape: f32[1,512], index: 6, kind: input, shape index: {}]   ;;  %s2825_s7 = inlined_call_operand.hbm [shape: f32[32,512], index: 7, kind: output, shape index: {}]  }
   0x1   :  { %14 = vsyncpa [#allocation3 + $0x1], 0 }
   0x2   :  { %15 = vsyncpa [#allocation6], 0 }
   0x3   :  { %16 = vsyncpa [#allocation4], 0 }
   0x4   :  { %18 = vsyncpa [#allocation4 + $0x1], 0  ;;  %s2509_s24 = smov 0   ;;  %s2511_s25 = smov 0  }
   0x5   :  { %s2513_s26 = smov 0   ;;  %s2515_s27 = smov 0  }
   0x6 LB: > { %s2530_s28 = sadd.s32 4294967295, %s2456_s27   ;;  %s1806_s29 = sadd.s32 4294967294, %s2456_s27   ;;  %s2456_s27 = sphi %s2515_s27, %s2845_s27   ;;  %s2452_s26 = sphi %s2513_s26, %s2844_s26   ;;  %s2448_s25 = sphi %s2511_s25, %s2843_s25   ;;  %s2444_s24 = sphi %s2509_s24, %s2842_s24  }
   0x7   : > { %p44_p0 = scmp.ne.s32.totalorder %s2448_s25, %s2444_s24  ;;  %p2826_p1 = scmp.eq.s32.totalorder %s2530_s28, 0 }
   0x8   : > { %p200_p3 = scmp.eq.s32.totalorder %s1806_s29, 1  ;;  %p1807_p5 = scmp.ge.s32.totalorder %s2456_s27, 1 }
   0x9   : > { %p2539_p4 = por %p2826_p1, %p44_p0  ;;  %p207_p7 = scmp.lt.s32.totalorder %s2456_s27, 3 }
   0xa   : > { %p2544_p6 = por %p200_p3, %p44_p0  ;;  %s2458_s10 = smov [#allocation5]  }
   0xb   : > { %s2829_s30 = scalar_select %p2539_p4, 1, 0 }
   0xc   : > { %s2830_s8 = scalar_select %p2544_p6, 1, 0 }
   0xd   : > { %p2549_p8 = pnand %p1807_p5, %p207_p7  ;;  %s219_s11 = sshll.u32 %s2458_s10, 4  ;;  %s2553_s11 = int_to_ptr.vmem [resolvable:$true] %s219_s11 }
   0xe   : > { %s2459_s13 = smov [#allocation7]   ;;  %s2300_s17 = scalar_lea.hbm %s2819_s1, 2048 }
   0xf   : > { %p2002_p9 = pneg %p2549_p8  ;;  %s235_s14 = sshll.u32 %s2459_s13, 4  ;;  %s2564_s14 = int_to_ptr.vmem [resolvable:$true] %s235_s14 }
  0x10   : > { %p2301_p12 = scmp.ne.s32.totalorder %s2819_s1, %s2300_s17  ;;  %p2307_p5 = scmp.lt.u32.totalorder %s2300_s17, %s2819_s1 }
  0x11   : > { %p2560_p11 = pnand %p2002_p9, %p2826_p1 }
  0x13   : > { %p2302_p13 = pneg %p2560_p11 }
  0x15   : > { %p2303_p0 = pnand %p2302_p13, %p2301_p12 }
  0x17   : > { %p2304_p3 = pneg %p2303_p0 }
  0x19   : > { %p2309_p7 = pnand %p2307_p5, %p2304_p3 }
  0x1b   : > { %2312 = shalt.err (!%p2309_p7)
}
  0x1c   : > { %s2313_s22 = scalar_lea.vmem %s2553_s11, 2048  ;;  %p2321_p2 = scmp.lt.s32.totalorder %s2553_s11, %s2553_s11 }
  0x1d   : > { %p2314_p9 = scmp.ne.s32.totalorder %s2553_s11, %s2313_s22  ;;  %p2322_p12 = scmp.lt.s32.totalorder %s2313_s22, %s2313_s22 }
  0x1f   : > { %p2316_p10 = pnand %p2314_p9, %p2302_p13  ;;  %p2323_p0 = por %p2322_p12, %p2321_p2 }
  0x21   : > { %p2317_p1 = pneg %p2316_p10 }
  0x23   : > { %p2324_p6 = pnand %p2323_p0, %p2317_p1 }
  0x25   : > { %2327 = shalt.err (!%p2324_p6)
}
  0x26   : > { %s2460_s23 = smov 256   ;;  %s2461_s29 = smov 16  }
  0x27   : > { %2005 = dma.hbm_to_vmem [thread:$0]  (!%p2560_p11), %s2819_s1, 2048, %s2553_s11, [#allocation6], %s2460_s23, %s2460_s23, %s2461_s29  }
  0x28   : > { %s2328_s17 = scalar_lea.hbm %s2821_s3, 16384 }
  0x29   : > { %p2329_p2 = scmp.ne.s32.totalorder %s2821_s3, %s2328_s17  ;;  %p2335_p10 = scmp.lt.u32.totalorder %s2328_s17, %s2821_s3 }
  0x2b   : > { %p2331_p1 = pnand %p2329_p2, %p2302_p13 }
  0x2d   : > { %p2332_p6 = pneg %p2331_p1 }
  0x2f   : > { %p2337_p3 = pnand %p2335_p10, %p2332_p6 }
  0x31   : > { %2340 = shalt.err (!%p2337_p3)
}
  0x32   : > { %s2341_s11 = scalar_lea.vmem %s2564_s14, 16384  ;;  %p2349_p12 = scmp.lt.s32.totalorder %s2564_s14, %s2564_s14 }
  0x33   : > { %p2342_p5 = scmp.ne.s32.totalorder %s2564_s14, %s2341_s11  ;;  %p2350_p0 = scmp.lt.s32.totalorder %s2341_s11, %s2341_s11 }
  0x35   : > { %p2344_p7 = pnand %p2342_p5, %p2302_p13  ;;  %p2351_p2 = por %p2350_p0, %p2349_p12 }
  0x37   : > { %p2345_p9 = pneg %p2344_p7 }
  0x39   : > { %p2352_p1 = pnand %p2351_p2, %p2345_p9 }
  0x3b   : > { %2355 = shalt.err (!%p2352_p1)
}
  0x3c   : > { %2008 = dma.hbm_to_vmem [thread:$0]  (!%p2560_p11), %s2821_s3, 16384, %s2564_s14, [#allocation6], %s2460_s23, %s2460_s23, %s2461_s29  }
  0x3d   : > { %s2619_s13 = sadd.s32 1, %s2456_s27   ;;  %s31_s12 = sadd.s32 1, %s2452_s26 }
  0x3e   : > { %s28_s15 = ssub.s32 %s2456_s27, %s2619_s13  ;;  %p38_p13 = scmp.ne.s32.totalorder %s2452_s26, %s2448_s25 }
  0x3f   : > { %p29_p6 = scmp.eq.s32.totalorder %s28_s15, 0  ;;  %p39_p10 = scmp.eq.s32.totalorder %s2456_s27, 0 }
  0x40   : > { %p2833_p3 = scmp.eq.s32.totalorder %s2530_s28, 1  ;;  %p2019_p7 = scmp.lt.s32.totalorder %s2456_s27, 2 }
  0x41   : > { %s2635_s17 = scalar_select %p29_p6, %s2452_s26, %s31_s12  }
  0x42   : > { %p2629_p5 = por %p2833_p3, %p38_p13  ;;  %p40_p9 = por %p39_p10, %p38_p13 }
  0x43   : > { %s258_s18 = sand.u32 1, %s2452_s26   ;;  %s1971_s14 = sshll.u32 %s2456_s27, 8 }
  0x44   : > { %s2834_s16 = scalar_select %p2629_p5, 1, 0 }
  0x45   : > { %s1811_s19 = sshll.u32 %s258_s18, 4  ;;  %s2642_s20 = scalar_lea.hbm %s2818_s0, %s1971_s14 }
  0x46   : > { %s262_s21 = scalar_lea.vmem [#allocation2], %s1811_s19  ;;  %p2646_p11 = pnand %p2019_p7, %p40_p9 }
  0x47   : > { %s269_s11 = sshll.u32 %s262_s21, 4  ;;  %s2650_s10 = scalar_lea.sflag [#allocation3], %s258_s18  ;;  %s2644_s11 = int_to_ptr.vmem [resolvable:$true] %s269_s11 }
  0x48   : > { %s2356_s12 = scalar_lea.hbm %s2642_s20, 256  ;;  %p2358_p0 = pneg %p2646_p11 }
  0x49   : > { %p2357_p12 = scmp.ne.s32.totalorder %s2642_s20, %s2356_s12  ;;  %s2361_s14 = scalar_lea.hbm %s2818_s0, 512 }
  0x4a   : > { %p2362_p13 = scmp.lt.u32.totalorder %s2642_s20, %s2818_s0  ;;  %p2363_p6 = scmp.lt.u32.totalorder %s2361_s14, %s2356_s12 }
  0x4b   : > { %p2359_p2 = pnand %p2358_p0, %p2357_p12  ;;  %p2365_p3 = scmp.lt.u32.totalorder %s2356_s12, %s2642_s20 }
  0x4c   : > { %p2364_p10 = por %p2363_p6, %p2362_p13 }
  0x4d   : > { %p2360_p1 = pneg %p2359_p2 }
  0x4e   : > { %p2366_p7 = por %p2365_p3, %p2364_p10 }
  0x50   : > { %p2367_p9 = pnand %p2366_p7, %p2360_p1 }
  0x52   : > { %2370 = shalt.err (!%p2367_p9)
}
  0x53   : > { %s2371_s18 = scalar_lea.vmem %s2644_s11, 256  ;;  %s2462_s21 = smov [#allocation2]  }
  0x54   : > { %p2372_p12 = scmp.ne.s32.totalorder %s2644_s11, %s2371_s18  ;;  %s2376_s15 = sshll.u32 %s2462_s21, 4  ;;  %s2377_s15 = int_to_ptr.vmem [resolvable:$false] %s2376_s15 }
  0x55   : > { %s2378_s19 = scalar_lea.vmem %s2377_s15, 512  ;;  %p2379_p4 = scmp.lt.s32.totalorder %s2644_s11, %s2377_s15 }
  0x56   : > { %p2374_p2 = pnand %p2372_p12, %p2358_p0  ;;  %p2380_p13 = scmp.lt.s32.totalorder %s2378_s19, %s2371_s18 }
  0x58   : > { %p2375_p5 = pneg %p2374_p2  ;;  %p2381_p6 = por %p2380_p13, %p2379_p4 }
  0x5a   : > { %p2382_p10 = pnand %p2381_p6, %p2375_p5 }
  0x5c   : > { %2385 = shalt.err (!%p2382_p10)
}
  0x5d   : > { %s2463_s12 = smov 128   ;;  %s2464_s14 = smov 8  }
  0x5e   : > { %2012 = dma.hbm_to_vmem [thread:$0]  (!%p2646_p11), %s2642_s20, 256, %s2644_s11, %s2650_s10, %s2463_s12, %s2463_s12, %s2464_s14  }
  0x5f   : > { %281 = sbr.rel (%p2549_p8) target bundleno = 992 (0x3e0), region = 48  ;;  %s2681_s23 = sand.u32 (!%p2549_p8), 1, %s2448_s25  }
  0x60   : > { %s1815_s29 = sshll.u32 (!%p2549_p8), %s2681_s23, 4  ;;  %s284_s18 = scalar_lea.sflag (!%p2549_p8), [#allocation3], %s2681_s23 }
  0x61   : > { %s2685_s21 = scalar_lea.vmem (!%p2549_p8), [#allocation2], %s1815_s29  ;;  %p2836_p4 = scmp.ne.s32.totalorder (!%p2549_p8), %s2829_s30, 0 }
  0x66   : > { %2431 = dma.done.wait (%p2836_p4), %s284_s18, 256  }
  0x67   : > { %2433 = vsyncadd (%p2836_p4), %s284_s18, 4294967040  ;;  %p2837_p5 = scmp.eq.s32.totalorder %s2530_s28, 0 }
  0x69   : > { %2435 = dma.done.wait (%p2837_p5), [#allocation6], 18432   ;;  %p2838_p8 = pmov %p2837_p5 }
  0x6a   : > { %v2465_v0 = vmov 0   ;;  %v2064_v1 = vld [vmem:[#allocation5 + $0x4] ss:$16 sps:$4 sm:$0xff]   ;;  %v2066_v2 = vld [vmem:[#allocation5] ss:$16 sps:$4 sm:$0xff]   ;;  %v330_v15 = vld [vmem:[%s2685_s21 + $0x8] sm:$0xff] }
  0x6b   : > { %2437 = vsyncadd (%p2838_p8), [#allocation6], 4294948864  ;;  %486 = vmatprep.mubr.bf16.mxu0 %v2465_v0  ;;  %529 = vmatprep.mubr.bf16.mxu1 %v2465_v0  ;;  %v2067_v3 = vld [vmem:[#allocation5 + $0x24] ss:$16 sps:$4 sm:$0xff]   ;;  %v2069_v4 = vld [vmem:[#allocation5 + $0x20] ss:$16 sps:$4 sm:$0xff]  }
  0x6c   : > { %454 = vmatprep.subr.bf16.mxu0 %v2064_v1  ;;  %v2070_v5 = vld [vmem:[#allocation5 + $0x44] ss:$16 sps:$4 sm:$0xff]   ;;  %v2072_v6 = vld [vmem:[#allocation5 + $0x40] ss:$16 sps:$4 sm:$0xff]   ;;  %v2076_v7 = vld [vmem:[#allocation5 + $0xc] ss:$16 sps:$4 sm:$0xff]  }
  0x6d   : > { %455 = vmatpush1.bf16.msra.mxu0 %v2066_v2  ;;  %v2078_v8 = vld [vmem:[#allocation5 + $0x8] ss:$16 sps:$4 sm:$0xff]   ;;  %v2073_v9 = vld [vmem:[#allocation5 + $0x64] ss:$16 sps:$4 sm:$0xff]   ;;  %497 = vmatprep.subr.bf16.mxu1 %v2076_v7  ;;  %v2079_v10 = vld [vmem:[#allocation5 + $0x2c] ss:$16 sps:$4 sm:$0xff]  }
  0x6e   : > { %456 = vmatprep.subr.bf16.mxu0 %v2067_v3  ;;  %v2075_v11 = vld [vmem:[#allocation5 + $0x60] ss:$16 sps:$4 sm:$0xff]   ;;  %498 = vmatpush1.bf16.msra.mxu1 %v2078_v8  ;;  %v2081_v13 = vld [vmem:[#allocation5 + $0x28] ss:$16 sps:$4 sm:$0xff]   ;;  %v2082_v14 = vld [vmem:[#allocation5 + $0x4c] ss:$16 sps:$4 sm:$0xff]  }
  0x6f   : > { %v329_v12 = vld [vmem:[%s2685_s21] sm:$0xff]  ;;  %499 = vmatprep.subr.bf16.mxu1 %v2079_v10  ;;  %v2084_v17 = vld [vmem:[#allocation5 + $0x48] ss:$16 sps:$4 sm:$0xff]   ;;  %v2085_v19 = vld [vmem:[#allocation5 + $0x6c] ss:$16 sps:$4 sm:$0xff]   ;;  %vm450_vm0 = vcmask 523264  }
  0x70   : > { %v2090_v16 = vld [vmem:[#allocation7 + $0x4] ss:$16 sps:$4 sm:$0xff]   ;;  %v331_v18 = vpack.c.bf16 %v330_v15, %v329_v12  ;;  %v2088_v20 = vld [vmem:[#allocation7] ss:$16 sps:$4 sm:$0xff]   ;;  %v2087_v22 = vld [vmem:[#allocation5 + $0x68] ss:$16 sps:$4 sm:$0xff]  }
  0x71   : > { %457 = vmatpush1.bf16.msra.mxu0 %v2069_v4  ;;  %v2096_v21 = vld [vmem:[#allocation7 + $0x24] ss:$16 sps:$4 sm:$0xff]   ;;  %v2093_v23 = vld [vmem:[#allocation7 + $0xc] ss:$16 sps:$4 sm:$0xff]   ;;  %v2094_v24 = vld [vmem:[#allocation7 + $0x20] ss:$16 sps:$4 sm:$0xff]  }
  0x72   : > { %458 = vmatprep.subr.bf16.mxu0 %v2070_v5  ;;  %500 = vmatpush1.bf16.msra.mxu1 %v2081_v13  ;;  %v2102_v25 = vld [vmem:[#allocation7 + $0x44] ss:$16 sps:$4 sm:$0xff]   ;;  %v2091_v26 = vld [vmem:[#allocation7 + $0x8] ss:$16 sps:$4 sm:$0xff]   ;;  %v2099_v27 = vld [vmem:[#allocation7 + $0x2c] ss:$16 sps:$4 sm:$0xff]  }
  0x73   : > { %501 = vmatprep.subr.bf16.mxu1 %v2082_v14  ;;  %v2100_v28 = vld [vmem:[#allocation7 + $0x40] ss:$16 sps:$4 sm:$0xff]   ;;  %v2108_v29 = vld [vmem:[#allocation7 + $0x64] ss:$16 sps:$4 sm:$0xff]   ;;  %v2097_v30 = vld [vmem:[#allocation7 + $0x28] ss:$16 sps:$4 sm:$0xff]  }
  0x74   : > { %v2105_v31 = vld [vmem:[#allocation7 + $0x4c] ss:$16 sps:$4 sm:$0xff]   ;;  %v2106_v32 = vld [vmem:[#allocation7 + $0x60] ss:$16 sps:$4 sm:$0xff]   ;;  %v2114_v33 = vld [vmem:[#allocation7 + $0x84] ss:$16 sps:$4 sm:$0xff]  }
  0x75   : > { %459 = vmatpush1.bf16.msra.mxu0 %v2072_v6  ;;  %v2103_v34 = vld [vmem:[#allocation7 + $0x48] ss:$16 sps:$4 sm:$0xff]   ;;  %v2111_v35 = vld [vmem:[#allocation7 + $0x6c] ss:$16 sps:$4 sm:$0xff]   ;;  %v2112_v36 = vld [vmem:[#allocation7 + $0x80] ss:$16 sps:$4 sm:$0xff]  }
  0x76   : > { %460 = vmatprep.subr.bf16.mxu0 %v2073_v9  ;;  %502 = vmatpush1.bf16.msra.mxu1 %v2084_v17  ;;  %v2109_v37 = vld [vmem:[#allocation7 + $0x68] ss:$16 sps:$4 sm:$0xff]   ;;  %v2117_v38 = vld [vmem:[#allocation7 + $0x8c] ss:$16 sps:$4 sm:$0xff]   ;;  %v2120_v39 = vld [vmem:[#allocation7 + $0xa4] ss:$16 sps:$4 sm:$0xff]  }
  0x77   : > { %503 = vmatprep.subr.bf16.mxu1 %v2085_v19  ;;  %v2118_v40 = vld [vmem:[#allocation7 + $0xa0] ss:$16 sps:$4 sm:$0xff]   ;;  %v2126_v41 = vld [vmem:[#allocation7 + $0xc4] ss:$16 sps:$4 sm:$0xff]   ;;  %v2115_v42 = vld [vmem:[#allocation7 + $0x88] ss:$16 sps:$4 sm:$0xff]  }
  0x78   : > { %v2123_v43 = vld [vmem:[#allocation7 + $0xac] ss:$16 sps:$4 sm:$0xff]   ;;  %v2124_v44 = vld [vmem:[#allocation7 + $0xc0] ss:$16 sps:$4 sm:$0xff]   ;;  %v2132_v45 = vld [vmem:[#allocation7 + $0xe4] ss:$16 sps:$4 sm:$0xff]  }
  0x79   : > { %461 = vmatpush1.bf16.msra.mxu0 %v2075_v11  ;;  %v2121_v46 = vld [vmem:[#allocation7 + $0xa8] ss:$16 sps:$4 sm:$0xff]   ;;  %v2129_v47 = vld [vmem:[#allocation7 + $0xcc] ss:$16 sps:$4 sm:$0xff]   ;;  %v2130_v48 = vld [vmem:[#allocation7 + $0xe0] ss:$16 sps:$4 sm:$0xff]  }
  0x7a   : > { %1406 = vmatprep.subr.bf16.mxu0 %v2090_v16  ;;  %504 = vmatpush1.bf16.msra.mxu1 %v2087_v22  ;;  %v2127_v49 = vld [vmem:[#allocation7 + $0xc8] ss:$16 sps:$4 sm:$0xff]   ;;  %v2135_v50 = vld [vmem:[#allocation7 + $0xec] ss:$16 sps:$4 sm:$0xff]   ;;  %v2138_v52 = vld [vmem:[#allocation7 + $0x104] ss:$16 sps:$4 sm:$0xff]   ;;  %v350_v22 = vlaneseq }
  0x7b   : > { %1492 = vmatprep.subr.bf16.mxu1 %v2093_v23  ;;  %v2133_v51 = vld [vmem:[#allocation7 + $0xe8] ss:$16 sps:$4 sm:$0xff]   ;;  %v2141_v53 = vld [vmem:[#allocation7 + $0x10c] ss:$16 sps:$4 sm:$0xff]   ;;  %v2136_v54 = vld [vmem:[#allocation7 + $0x100] ss:$16 sps:$4 sm:$0xff]  }
  0x7c   : > { %1835 = vmatmul.mubr.msk.bf16.vlgmr.msra.gmra.mrb[0].mxu0 %vm450_vm0, %v331_v18  ;;  %v2139_v55 = vld [vmem:[#allocation7 + $0x108] ss:$16 sps:$4 sm:$0xff]   ;;  %v2144_v56 = vld [vmem:[#allocation7 + $0x124] ss:$16 sps:$4 sm:$0xff]   ;;  %v2147_v57 = vld [vmem:[#allocation7 + $0x12c] ss:$16 sps:$4 sm:$0xff]  }
  0x7d   : > { %1407 = vmatpush1.bf16.msra.mxu0 %v2088_v20  ;;  %1836 = vmatmul.mubr.msk.bf16.vlgmr.msra.gmra.mrb[0].mxu1 %vm450_vm0, %v331_v18  ;;  %v2142_v58 = vld [vmem:[#allocation7 + $0x120] ss:$16 sps:$4 sm:$0xff]   ;;  %v2145_v59 = vld [vmem:[#allocation7 + $0x128] ss:$16 sps:$4 sm:$0xff]   ;;  %v2150_v60 = vld [vmem:[#allocation7 + $0x144] ss:$16 sps:$4 sm:$0xff]  }
  0x7e   : > { %1408 = vmatprep.subr.bf16.mxu0 %v2096_v21  ;;  %1493 = vmatpush1.bf16.msra.mxu1 %v2091_v26  ;;  %v2153_v61 = vld [vmem:[#allocation7 + $0x14c] ss:$16 sps:$4 sm:$0xff]   ;;  %v2148_v62 = vld [vmem:[#allocation7 + $0x140] ss:$16 sps:$4 sm:$0xff]   ;;  %v2151_v63 = vld [vmem:[#allocation7 + $0x148] ss:$16 sps:$4 sm:$0xff]  }
  0x7f   : > { %1494 = vmatprep.subr.bf16.mxu1 %v2099_v27  ;;  %v2156_v0 = vld [vmem:[#allocation7 + $0x164] ss:$16 sps:$4 sm:$0xff]   ;;  %v2159_v1 = vld [vmem:[#allocation7 + $0x16c] ss:$16 sps:$4 sm:$0xff]   ;;  %v2154_v2 = vld [vmem:[#allocation7 + $0x160] ss:$16 sps:$4 sm:$0xff]  }
  0x80   : > { %v2157_v3 = vld [vmem:[#allocation7 + $0x168] ss:$16 sps:$4 sm:$0xff]   ;;  %v2160_v4 = vld [vmem:[#allocation7 + $0x180] ss:$16 sps:$4 sm:$0xff]   ;;  %v2162_v5 = vld [vmem:[#allocation7 + $0x184] ss:$16 sps:$4 sm:$0xff]  }
  0x81   : > { %1409 = vmatpush1.bf16.msra.mxu0 %v2094_v24  ;;  %v2163_v6 = vld [vmem:[#allocation7 + $0x188] ss:$16 sps:$4 sm:$0xff]   ;;  %v2165_v7 = vld [vmem:[#allocation7 + $0x18c] ss:$16 sps:$4 sm:$0xff]   ;;  %v2168_v8 = vld [vmem:[#allocation7 + $0x1a4] ss:$16 sps:$4 sm:$0xff]  }
  0x82   : > { %1410 = vmatprep.subr.bf16.mxu0 %v2102_v25  ;;  %1495 = vmatpush1.bf16.msra.mxu1 %v2097_v30  ;;  %v2171_v9 = vld [vmem:[#allocation7 + $0x1ac] ss:$16 sps:$4 sm:$0xff]   ;;  %v2166_v10 = vld [vmem:[#allocation7 + $0x1a0] ss:$16 sps:$4 sm:$0xff]   ;;  %v2169_v11 = vld [vmem:[#allocation7 + $0x1a8] ss:$16 sps:$4 sm:$0xff]  }
  0x83   : > { %1496 = vmatprep.subr.bf16.mxu1 %v2105_v31  ;;  %v2174_v12 = vld [vmem:[#allocation7 + $0x1c4] ss:$16 sps:$4 sm:$0xff]   ;;  %v2177_v13 = vld [vmem:[#allocation7 + $0x1cc] ss:$16 sps:$4 sm:$0xff]   ;;  %v2172_v14 = vld [vmem:[#allocation7 + $0x1c0] ss:$16 sps:$4 sm:$0xff]  }
  0x84   : > { %v2175_v15 = vld [vmem:[#allocation7 + $0x1c8] ss:$16 sps:$4 sm:$0xff]   ;;  %v2180_v16 = vld [vmem:[#allocation7 + $0x1e4] ss:$16 sps:$4 sm:$0xff]   ;;  %v2183_v17 = vld [vmem:[#allocation7 + $0x1ec] ss:$16 sps:$4 sm:$0xff]  }
  0x85   : > { %1411 = vmatpush1.bf16.msra.mxu0 %v2100_v28  ;;  %v2178_v18 = vld [vmem:[#allocation7 + $0x1e0] ss:$16 sps:$4 sm:$0xff]   ;;  %v2181_v19 = vld [vmem:[#allocation7 + $0x1e8] ss:$16 sps:$4 sm:$0xff]   ;;  %v2186_v20 = vld [vmem:[#allocation7 + $0x204] ss:$16 sps:$4 sm:$0xff]  }
  0x86   : > { %1412 = vmatprep.subr.bf16.mxu0 %v2108_v29  ;;  %1497 = vmatpush1.bf16.msra.mxu1 %v2103_v34  ;;  %v2189_v21 = vld [vmem:[#allocation7 + $0x20c] ss:$16 sps:$4 sm:$0xff]   ;;  %v351_v23 = vshrl.u32 %v350_v22, 7  ;;  %v348_v25 = vld [vmem:[%s2820_s2] sm:$0xf]  ;;  %s1818_s12 = sshll.u32 %s2681_s23, 6 }
  0x87   : > { %1498 = vmatprep.subr.bf16.mxu1 %v2111_v35  ;;  %s1973_s14 = sshll.u32 %s2530_s28, 10  ;;  %s325_s29 = scalar_lea.vmem [#allocation8], %s1818_s12 }
  0x88   : > { %v2699_v24 = vsub.s32 0, %v351_v23  ;;  %v2704_v26 = vsub.s32 1, %v351_v23  ;;  %v2708_v29 = vsub.s32 2, %v351_v23  ;;  %v2710_v31 = vsub.s32 3, %v351_v23  ;;  %s1714_s18 = sshll.u32 %s325_s29, 4  ;;  %s2772_s9 = scalar_lea.hbm %s2825_s7, %s1973_s14  ;;  %s2774_s18 = int_to_ptr.vmem [resolvable:$true] %s1714_s18 }
  0x89   : > { %1413 = vmatpush1.bf16.msra.mxu0 %v2106_v32  ;;  %s1700_s28 = scalar_lea.sflag [#allocation4], %s2681_s23  ;;  %s2386_s20 = scalar_lea.vmem %s2774_s18, 1024 }
  0x8a   : > { %1414 = vmatprep.subr.bf16.mxu0 %v2114_v33  ;;  %1499 = vmatpush1.bf16.msra.mxu1 %v2109_v37  ;;  %v353_v27 = vrot.slane %v348_v25, %v2699_v24  ;;  %v357_v28 = vrot.slane %v348_v25, %v2704_v26  ;;  %p2387_p11 = scmp.ne.s32.totalorder %s2774_s18, %s2386_s20  ;;  %p2839_p0 = scmp.ne.s32.totalorder %s2834_s16, 0 }
  0x8b   : > { %1500 = vmatprep.subr.bf16.mxu1 %v2117_v38  ;;  %s2466_s11 = smov [#allocation8]  }
  0x8c   : > { %p2388_p1 = pnand %p2387_p11, %p2839_p0  ;;  %s2390_s22 = sshll.u32 %s2466_s11, 4  ;;  %s2391_s22 = int_to_ptr.vmem [resolvable:$false] %s2390_s22 }
  0x8d   : > { %1415 = vmatpush1.bf16.msra.mxu0 %v2112_v36  ;;  %s2392_s10 = scalar_lea.vmem %s2391_s22, 2048  ;;  %p2393_p7 = scmp.lt.s32.totalorder %s2774_s18, %s2391_s22 }
  0x8e   : > { %1416 = vmatprep.subr.bf16.mxu0 %v2120_v39  ;;  %1501 = vmatpush1.bf16.msra.mxu1 %v2115_v42  ;;  %v361_v39 = vrot.slane %v348_v25, %v2708_v29  ;;  %v365_v42 = vrot.slane %v348_v25, %v2710_v31  ;;  %p2389_p3 = pneg %p2388_p1  ;;  %p2394_p9 = scmp.lt.s32.totalorder %s2392_s10, %s2386_s20 }
  0x8f   : > { %1502 = vmatprep.subr.bf16.mxu1 %v2123_v43 }
  0x90   : > { %p2395_p12 = por %p2394_p9, %p2393_p7 }
  0x91   : > { %1417 = vmatpush1.bf16.msra.mxu0 %v2118_v40 }
  0x92   : > { %1418 = vmatprep.subr.bf16.mxu0 %v2126_v41  ;;  %1503 = vmatpush1.bf16.msra.mxu1 %v2121_v46  ;;  %p2396_p2 = pnand %p2395_p12, %p2389_p3 }
  0x93   : > { %1504 = vmatprep.subr.bf16.mxu1 %v2129_v47 }
  0x95   : > { %1419 = vmatpush1.bf16.msra.mxu0 %v2124_v44 }
  0x96   : > { %1420 = vmatprep.subr.bf16.mxu0 %v2132_v45  ;;  %1505 = vmatpush1.bf16.msra.mxu1 %v2127_v49 }
  0x97   : > { %1506 = vmatprep.subr.bf16.mxu1 %v2135_v50 }
  0x99   : > { %1421 = vmatpush1.bf16.msra.mxu0 %v2130_v48 }
  0x9a   : > { %1507 = vmatpush1.bf16.msra.mxu1 %v2133_v51  ;;  %1422 = vmatprep.subr.bf16.mxu0 %v2138_v52 }
  0x9b   : > { %1508 = vmatprep.subr.bf16.mxu1 %v2141_v53 }
  0x9d   : > { %1423 = vmatpush1.bf16.msra.mxu0 %v2136_v54 }
  0x9e   : > { %1509 = vmatpush1.bf16.msra.mxu1 %v2139_v55  ;;  %1424 = vmatprep.subr.bf16.mxu0 %v2144_v56 }
  0x9f   : > { %1510 = vmatprep.subr.bf16.mxu1 %v2147_v57 }
  0xa1   : > { %1425 = vmatpush1.bf16.msra.mxu0 %v2142_v58 }
  0xa2   : > { %1511 = vmatpush1.bf16.msra.mxu1 %v2145_v59  ;;  %1426 = vmatprep.subr.bf16.mxu0 %v2150_v60 }
  0xa3   : > { %1512 = vmatprep.subr.bf16.mxu1 %v2153_v61 }
  0xa5   : > { %1427 = vmatpush1.bf16.msra.mxu0 %v2148_v62 }
  0xa6   : > { %1513 = vmatpush1.bf16.msra.mxu1 %v2151_v63  ;;  %1428 = vmatprep.subr.bf16.mxu0 %v2156_v0 }
  0xa7   : > { %1514 = vmatprep.subr.bf16.mxu1 %v2159_v1 }
  0xa9   : > { %1429 = vmatpush1.bf16.msra.mxu0 %v2154_v2 }
  0xaa   : > { %1515 = vmatpush1.bf16.msra.mxu1 %v2157_v3  ;;  %1430 = vmatprep.subr.bf16.mxu0 %v2162_v5 }
  0xab   : > { %1516 = vmatprep.subr.bf16.mxu1 %v2165_v7 }
  0xad   : > { %1431 = vmatpush1.bf16.msra.mxu0 %v2160_v4 }
  0xae   : > { %1517 = vmatpush1.bf16.msra.mxu1 %v2163_v6  ;;  %1432 = vmatprep.subr.bf16.mxu0 %v2168_v8 }
  0xaf   : > { %1518 = vmatprep.subr.bf16.mxu1 %v2171_v9 }
  0xb1   : > { %1433 = vmatpush1.bf16.msra.mxu0 %v2166_v10 }
  0xb2   : > { %1519 = vmatpush1.bf16.msra.mxu1 %v2169_v11  ;;  %1434 = vmatprep.subr.bf16.mxu0 %v2174_v12 }
  0xb3   : > { %1520 = vmatprep.subr.bf16.mxu1 %v2177_v13 }
  0xb5   : > { %1435 = vmatpush1.bf16.msra.mxu0 %v2172_v14 }
  0xb6   : > { %1521 = vmatpush1.bf16.msra.mxu1 %v2175_v15  ;;  %1436 = vmatprep.subr.bf16.mxu0 %v2180_v16 }
  0xb7   : > { %1522 = vmatprep.subr.bf16.mxu1 %v2183_v17 }
  0xb9   : > { %1437 = vmatpush1.bf16.msra.mxu0 %v2178_v18 }
  0xba   : > { %1523 = vmatpush1.bf16.msra.mxu1 %v2181_v19  ;;  %1449 = vmatprep.subr.bf16.mxu0 %v2186_v20 }
  0xbb   : > { %1535 = vmatprep.subr.bf16.mxu1 %v2189_v21 }
 0x14f   : > { %v488_v30 = vpop.f32.mrb[0].mxu0 }
 0x150   : > { %v2712_v32 = vadd.f32 %v488_v30, %v353_v27  ;;  %v490_v33 = vpop.f32.mrb[1].mxu0  ;;  %v531_v47 = vpop.f32.mrb[0].mxu1 }
 0x151   : > { %v2714_v34 = vadd.f32 %v490_v33, %v357_v28  ;;  %v492_v35 = vpop.f32.mrb[2].mxu0  ;;  %v532_v50 = vadd.f32 %v531_v47, %v361_v39  ;;  %v533_v51 = vpop.f32.mrb[1].mxu1 }
 0x152   : > { %v548_v36 = vmul.f32 0.044715, %v2712_v32  ;;  %v2717_v37 = vadd.f32 %v492_v35, %v353_v27  ;;  %v494_v38 = vpop.f32.mrb[3].mxu0  ;;  %v534_v54 = vadd.f32 %v533_v51, %v365_v42  ;;  %v535_v55 = vpop.f32.mrb[2].mxu1 }
 0x153   : > { %v549_v40 = vmul.f32 0.044715, %v2714_v34  ;;  %v2721_v41 = vadd.f32 %v494_v38, %v357_v28  ;;  %v550_v58 = vmul.f32 0.044715, %v532_v50  ;;  %v536_v59 = vadd.f32 %v535_v55, %v361_v39  ;;  %v537_v60 = vpop.f32.mrb[3].mxu1 }
 0x154   : > { %v556_v43 = vmul.f32 %v548_v36, %v2712_v32  ;;  %v552_v44 = vmul.f32 0.044715, %v2717_v37  ;;  %v551_v63 = vmul.f32 0.044715, %v534_v54  ;;  %v538_v0 = vadd.f32 %v537_v60, %v365_v42  ;;  %v2187_v60 = vld [vmem:[#allocation7 + $0x208] ss:$16 sps:$4 sm:$0xff]  }
 0x155   : > { %v557_v45 = vmul.f32 %v549_v40, %v2714_v34  ;;  %v553_v46 = vmul.f32 0.044715, %v2721_v41  ;;  %v558_v3 = vmul.f32 %v550_v58, %v532_v50  ;;  %v554_v4 = vmul.f32 0.044715, %v536_v59 }
 0x156   : > { %v564_v48 = vmul.f32 %v556_v43, %v2712_v32  ;;  %v560_v49 = vmul.f32 %v552_v44, %v2717_v37  ;;  %v559_v7 = vmul.f32 %v551_v63, %v534_v54  ;;  %v555_v8 = vmul.f32 0.044715, %v538_v0  ;;  %v2195_v63 = vld [vmem:[#allocation7 + $0x22c] ss:$16 sps:$4 sm:$0xff]  }
 0x157   : > { %v565_v52 = vmul.f32 %v557_v45, %v2714_v34  ;;  %v561_v53 = vmul.f32 %v553_v46, %v2721_v41  ;;  %v566_v10 = vmul.f32 %v558_v3, %v532_v50  ;;  %v562_v11 = vmul.f32 %v554_v4, %v536_v59  ;;  %v2193_v4 = vld [vmem:[#allocation7 + $0x228] ss:$16 sps:$4 sm:$0xff]  }
 0x158   : > { %v572_v56 = vadd.f32 %v564_v48, %v2712_v32  ;;  %v568_v57 = vmul.f32 %v560_v49, %v2717_v37  ;;  %v567_v13 = vmul.f32 %v559_v7, %v534_v54  ;;  %v563_v14 = vmul.f32 %v555_v8, %v538_v0 }
 0x159   : > { %v569_v61 = vmul.f32 %v561_v53, %v2721_v41  ;;  %v573_v62 = vadd.f32 %v565_v52, %v2714_v34  ;;  %v574_v15 = vadd.f32 %v566_v10, %v532_v50  ;;  %v570_v16 = vmul.f32 %v562_v11, %v536_v59  ;;  %v2199_v10 = vld [vmem:[#allocation7 + $0x248] ss:$16 sps:$4 sm:$0xff]   ;;  %v2204_v11 = vld [vmem:[#allocation7 + $0x264] ss:$16 sps:$4 sm:$0xff]  }
 0x15a   : > { %v580_v1 = vmul.f32 0.7978846, %v572_v56  ;;  %v576_v2 = vadd.f32 %v568_v57, %v2717_v37  ;;  %v571_v17 = vmul.f32 %v563_v14, %v538_v0  ;;  %v575_v18 = vadd.f32 %v567_v13, %v534_v54  ;;  %v2202_v13 = vld [vmem:[#allocation7 + $0x260] ss:$16 sps:$4 sm:$0xff]   ;;  %v2205_v14 = vld [vmem:[#allocation7 + $0x268] ss:$16 sps:$4 sm:$0xff]  }
 0x15b   : > { %v577_v5 = vadd.f32 %v569_v61, %v2721_v41  ;;  %v581_v6 = vmul.f32 0.7978846, %v573_v62  ;;  %v582_v19 = vmul.f32 0.7978846, %v574_v15  ;;  %v578_v20 = vadd.f32 %v570_v16, %v536_v59  ;;  %v2210_v15 = vld [vmem:[#allocation7 + $0x284] ss:$16 sps:$4 sm:$0xff]  }
 0x15c   : > { %2280 = vtanh.f32 %v580_v1  ;;  %v584_v9 = vmul.f32 0.7978846, %v576_v2  ;;  %v579_v21 = vadd.f32 %v571_v17, %v538_v0  ;;  %v583_v22 = vmul.f32 0.7978846, %v575_v18  ;;  %v2213_v16 = vld [vmem:[#allocation7 + $0x28c] ss:$16 sps:$4 sm:$0xff]  }
 0x15d   : > { %v585_v12 = vmul.f32 0.7978846, %v577_v5  ;;  %2282 = vtanh.f32 %v581_v6  ;;  %v586_v23 = vmul.f32 0.7978846, %v578_v20  ;;  %v540_v38 = vmul.f32 0.5, %v2712_v32 }
 0x15e   : > { %2284 = vtanh.f32 %v584_v9  ;;  %v587_v25 = vmul.f32 0.7978846, %v579_v21  ;;  %v544_v39 = vmul.f32 0.5, %v2717_v37  ;;  %v541_v42 = vmul.f32 0.5, %v2714_v34  ;;  %v2184_v37 = vld [vmem:[#allocation7 + $0x200] ss:$16 sps:$4 sm:$0xff]  }
 0x15f   : > { %2286 = vtanh.f32 %v585_v12  ;;  %v545_v43 = vmul.f32 0.5, %v2721_v41  ;;  %v542_v47 = vmul.f32 0.5, %v532_v50  ;;  %v543_v52 = vmul.f32 0.5, %v534_v54  ;;  %v2192_v41 = vld [vmem:[#allocation7 + $0x224] ss:$16 sps:$4 sm:$0xff]  }
 0x160   : > { %2288 = vtanh.f32 %v582_v19  ;;  %v546_v56 = vmul.f32 0.5, %v536_v59  ;;  %v547_v61 = vmul.f32 0.5, %v538_v0  ;;  %v2190_v59 = vld [vmem:[#allocation7 + $0x220] ss:$16 sps:$4 sm:$0xff]   ;;  %v2198_v0 = vld [vmem:[#allocation7 + $0x244] ss:$16 sps:$4 sm:$0xff]  }
 0x161   : > { %2290 = vtanh.f32 %v583_v22  ;;  %v2201_v6 = vld [vmem:[#allocation7 + $0x24c] ss:$16 sps:$4 sm:$0xff]   ;;  %v2196_v9 = vld [vmem:[#allocation7 + $0x240] ss:$16 sps:$4 sm:$0xff]   ;;  %v2211_v18 = vld [vmem:[#allocation7 + $0x288] ss:$16 sps:$4 sm:$0xff]  }
 0x162   : > { %2292 = vtanh.f32 %v586_v23  ;;  %v2207_v12 = vld [vmem:[#allocation7 + $0x26c] ss:$16 sps:$4 sm:$0xff]   ;;  %v2208_v17 = vld [vmem:[#allocation7 + $0x280] ss:$16 sps:$4 sm:$0xff]   ;;  %v2216_v19 = vld [vmem:[#allocation7 + $0x2a4] ss:$16 sps:$4 sm:$0xff]  }
 0x163   : > { %2294 = vtanh.f32 %v587_v25  ;;  %v2219_v20 = vld [vmem:[#allocation7 + $0x2ac] ss:$16 sps:$4 sm:$0xff]   ;;  %v2214_v21 = vld [vmem:[#allocation7 + $0x2a0] ss:$16 sps:$4 sm:$0xff]   ;;  %v2217_v22 = vld [vmem:[#allocation7 + $0x2a8] ss:$16 sps:$4 sm:$0xff]  }
 0x164   : > { %v2222_v23 = vld [vmem:[#allocation7 + $0x2c4] ss:$16 sps:$4 sm:$0xff]   ;;  %v2225_v25 = vld [vmem:[#allocation7 + $0x2cc] ss:$16 sps:$4 sm:$0xff]  }
 0x166   : > { %v2281_v27 = vpop.eup %2280 }
 0x167   : > { %v2283_v28 = vpop.eup %2282  ;;  %v596_v30 = vadd.f32 1.0, %v2281_v27  ;;  %v2220_v27 = vld [vmem:[#allocation7 + $0x2c0] ss:$16 sps:$4 sm:$0xff]  }
 0x168   : > { %v2285_v33 = vpop.eup %2284  ;;  %v597_v35 = vadd.f32 1.0, %v2283_v28  ;;  %v2223_v28 = vld [vmem:[#allocation7 + $0x2c8] ss:$16 sps:$4 sm:$0xff]  }
 0x169   : > { %v2287_v36 = vpop.eup %2286  ;;  %v600_v40 = vadd.f32 1.0, %v2285_v33  ;;  %v604_v45 = vmul.f32 %v596_v30, %v540_v38  ;;  %v2228_v30 = vld [vmem:[#allocation7 + $0x2e4] ss:$16 sps:$4 sm:$0xff]   ;;  %v2231_v33 = vld [vmem:[#allocation7 + $0x2ec] ss:$16 sps:$4 sm:$0xff]  }
 0x16a   : > { %v601_v44 = vadd.f32 1.0, %v2287_v36  ;;  %v2289_v48 = vpop.eup %2288  ;;  %v605_v49 = vmul.f32 %v597_v35, %v541_v42  ;;  %v2226_v35 = vld [vmem:[#allocation7 + $0x2e0] ss:$16 sps:$4 sm:$0xff]   ;;  %v2229_v36 = vld [vmem:[#allocation7 + $0x2e8] ss:$16 sps:$4 sm:$0xff]  }
 0x16b   : > { %v608_v46 = vmul.f32 %v600_v40, %v544_v39  ;;  %v2291_v53 = vpop.eup %2290  ;;  %v598_v57 = vadd.f32 1.0, %v2289_v48  ;;  %v2234_v38 = vld [vmem:[#allocation7 + $0x304] ss:$16 sps:$4 sm:$0xff]   ;;  %v2237_v39 = vld [vmem:[#allocation7 + $0x30c] ss:$16 sps:$4 sm:$0xff]  }
 0x16c   : > { %v609_v51 = vmul.f32 %v601_v44, %v545_v43  ;;  %v2293_v32 = vpop.eup %2292  ;;  %v599_v34 = vadd.f32 1.0, %v2291_v53  ;;  %v2232_v40 = vld [vmem:[#allocation7 + $0x300] ss:$16 sps:$4 sm:$0xff]   ;;  %v2235_v42 = vld [vmem:[#allocation7 + $0x308] ss:$16 sps:$4 sm:$0xff]  }
 0x16d   : > { %v612_v55 = vpack.c.bf16 %v608_v46, %v604_v45  ;;  %v2295_v62 = vpop.eup %2294  ;;  %v602_v1 = vadd.f32 1.0, %v2293_v32  ;;  %v606_v2 = vmul.f32 %v598_v57, %v542_v47  ;;  %v2240_v43 = vld [vmem:[#allocation7 + $0x324] ss:$16 sps:$4 sm:$0xff]   ;;  %v2243_v44 = vld [vmem:[#allocation7 + $0x32c] ss:$16 sps:$4 sm:$0xff]  }
 0x16e   : > { %v613_v58 = vpack.c.bf16 %v609_v51, %v605_v49  ;;  %v603_v50 = vadd.f32 1.0, %v2295_v62  ;;  %v607_v3 = vmul.f32 %v599_v34, %v543_v52  ;;  %v2238_v45 = vld [vmem:[#allocation7 + $0x320] ss:$16 sps:$4 sm:$0xff]   ;;  %v2241_v46 = vld [vmem:[#allocation7 + $0x328] ss:$16 sps:$4 sm:$0xff]  }
 0x16f   : > { %v610_v54 = vmul.f32 %v602_v1, %v546_v56  ;;  %v2246_v47 = vld [vmem:[#allocation7 + $0x344] ss:$16 sps:$4 sm:$0xff]   ;;  %v2249_v48 = vld [vmem:[#allocation7 + $0x34c] ss:$16 sps:$4 sm:$0xff]   ;;  %v2244_v49 = vld [vmem:[#allocation7 + $0x340] ss:$16 sps:$4 sm:$0xff]  }
 0x170   : > { %1438 = vmatprep.mubr.bf16.mxu0 %v613_v58  ;;  %1524 = vmatprep.mubr.bf16.mxu1 %v613_v58  ;;  %v611_v5 = vmul.f32 %v603_v50, %v547_v61  ;;  %v2247_v51 = vld [vmem:[#allocation7 + $0x348] ss:$16 sps:$4 sm:$0xff]   ;;  %v2252_v52 = vld [vmem:[#allocation7 + $0x364] ss:$16 sps:$4 sm:$0xff]   ;;  %v2255_v53 = vld [vmem:[#allocation7 + $0x36c] ss:$16 sps:$4 sm:$0xff]  }
 0x171   : > { %1439 = vmatmul.mubr.bf16.vlgmr.msra.gmra.mrb[4].mxu0 %v612_v55  ;;  %1525 = vmatmul.mubr.bf16.vlgmr.msra.gmra.mrb[4].mxu1 %v612_v55  ;;  %v2742_v7 = vpack.c.bf16 %v610_v54, %v606_v2  ;;  %v2250_v55 = vld [vmem:[#allocation7 + $0x360] ss:$16 sps:$4 sm:$0xff]   ;;  %v2253_v56 = vld [vmem:[#allocation7 + $0x368] ss:$16 sps:$4 sm:$0xff]   ;;  %v2258_v57 = vld [vmem:[#allocation7 + $0x384] ss:$16 sps:$4 sm:$0xff]  }
 0x172   : > { %1450 = vmatpush1.bf16.msra.mxu0 %v2184_v37  ;;  %1536 = vmatpush1.bf16.msra.mxu1 %v2187_v60  ;;  %v615_v8 = vpack.c.bf16 %v611_v5, %v607_v3  ;;  %v2261_v32 = vld [vmem:[#allocation7 + $0x38c] ss:$16 sps:$4 sm:$0xff]   ;;  %v2256_v58 = vld [vmem:[#allocation7 + $0x380] ss:$16 sps:$4 sm:$0xff]   ;;  %v2259_v37 = vld [vmem:[#allocation7 + $0x388] ss:$16 sps:$4 sm:$0xff]  }
 0x173   : > { %1451 = vmatprep.subr.bf16.mxu0 %v2192_v41  ;;  %1537 = vmatprep.subr.bf16.mxu1 %v2195_v63  ;;  %v2264_v60 = vld [vmem:[#allocation7 + $0x3a4] ss:$16 sps:$4 sm:$0xff]   ;;  %v2267_v61 = vld [vmem:[#allocation7 + $0x3ac] ss:$16 sps:$4 sm:$0xff]   ;;  %v2262_v34 = vld [vmem:[#allocation7 + $0x3a0] ss:$16 sps:$4 sm:$0xff]  }
 0x174   : > { %1481 = vmatprep.mubr.bf16.mxu0 %v615_v8  ;;  %1567 = vmatprep.mubr.bf16.mxu1 %v615_v8  ;;  %v2265_v62 = vld [vmem:[#allocation7 + $0x3a8] ss:$16 sps:$4 sm:$0xff]   ;;  %v2270_v41 = vld [vmem:[#allocation7 + $0x3c4] ss:$16 sps:$4 sm:$0xff]   ;;  %v2273_v63 = vld [vmem:[#allocation7 + $0x3cc] ss:$16 sps:$4 sm:$0xff]  }
 0x175   : > { %v2268_v1 = vld [vmem:[#allocation7 + $0x3c0] ss:$16 sps:$4 sm:$0xff]   ;;  %v2271_v2 = vld [vmem:[#allocation7 + $0x3c8] ss:$16 sps:$4 sm:$0xff]   ;;  %v2276_v50 = vld [vmem:[#allocation7 + $0x3e4] ss:$16 sps:$4 sm:$0xff]  }
 0x176   : > { %1452 = vmatpush1.bf16.msra.mxu0 %v2190_v59  ;;  %1538 = vmatpush1.bf16.msra.mxu1 %v2193_v4  ;;  %v2279_v3 = vld [vmem:[#allocation7 + $0x3ec] ss:$16 sps:$4 sm:$0xff]   ;;  %v2274_v54 = vld [vmem:[#allocation7 + $0x3e0] ss:$16 sps:$4 sm:$0xff]   ;;  %v2277_v59 = vld [vmem:[#allocation7 + $0x3e8] ss:$16 sps:$4 sm:$0xff]  }
 0x177   : > { %1453 = vmatprep.subr.bf16.mxu0 %v2198_v0  ;;  %1539 = vmatprep.subr.bf16.mxu1 %v2201_v6  ;;  %v744_v4 = vld [vmem:[%s2822_s4] sm:$0xf] }
 0x178   : > { %v749_v5 = vrot.slane %v744_v4, %v2699_v24  ;;  %v753_v0 = vrot.slane %v744_v4, %v2704_v26  ;;  %v757_v8 = vrot.slane %v744_v4, %v2708_v29 }
 0x17a   : > { %1454 = vmatpush1.bf16.msra.mxu0 %v2196_v9  ;;  %1540 = vmatpush1.bf16.msra.mxu1 %v2199_v10 }
 0x17b   : > { %1455 = vmatprep.subr.bf16.mxu0 %v2204_v11  ;;  %1541 = vmatprep.subr.bf16.mxu1 %v2207_v12 }
 0x17e   : > { %1456 = vmatpush1.bf16.msra.mxu0 %v2202_v13  ;;  %1542 = vmatpush1.bf16.msra.mxu1 %v2205_v14  ;;  %v761_v14 = vrot.slane %v744_v4, %v2710_v31  ;;  %v1661_v4 = vld [vmem:[%s2824_s6] sm:$0xf] }
 0x17f   : > { %1457 = vmatprep.subr.bf16.mxu0 %v2210_v15  ;;  %1543 = vmatprep.subr.bf16.mxu1 %v2213_v16 }
 0x182   : > { %1458 = vmatpush1.bf16.msra.mxu0 %v2208_v17  ;;  %1544 = vmatpush1.bf16.msra.mxu1 %v2211_v18 }
 0x183   : > { %1459 = vmatprep.subr.bf16.mxu0 %v2216_v19  ;;  %1545 = vmatprep.subr.bf16.mxu1 %v2219_v20 }
 0x186   : > { %1460 = vmatpush1.bf16.msra.mxu0 %v2214_v21  ;;  %1546 = vmatpush1.bf16.msra.mxu1 %v2217_v22 }
 0x187   : > { %1461 = vmatprep.subr.bf16.mxu0 %v2222_v23  ;;  %1547 = vmatprep.subr.bf16.mxu1 %v2225_v25 }
 0x18a   : > { %1462 = vmatpush1.bf16.msra.mxu0 %v2220_v27  ;;  %1548 = vmatpush1.bf16.msra.mxu1 %v2223_v28 }
 0x18b   : > { %1463 = vmatprep.subr.bf16.mxu0 %v2228_v30  ;;  %1549 = vmatprep.subr.bf16.mxu1 %v2231_v33 }
 0x18e   : > { %1464 = vmatpush1.bf16.msra.mxu0 %v2226_v35  ;;  %1550 = vmatpush1.bf16.msra.mxu1 %v2229_v36 }
 0x18f   : > { %1465 = vmatprep.subr.bf16.mxu0 %v2234_v38  ;;  %1551 = vmatprep.subr.bf16.mxu1 %v2237_v39 }
 0x192   : > { %1466 = vmatpush1.bf16.msra.mxu0 %v2232_v40  ;;  %1552 = vmatpush1.bf16.msra.mxu1 %v2235_v42 }
 0x193   : > { %1467 = vmatprep.subr.bf16.mxu0 %v2240_v43  ;;  %1553 = vmatprep.subr.bf16.mxu1 %v2243_v44 }
 0x196   : > { %1468 = vmatpush1.bf16.msra.mxu0 %v2238_v45  ;;  %1554 = vmatpush1.bf16.msra.mxu1 %v2241_v46 }
 0x197   : > { %1469 = vmatprep.subr.bf16.mxu0 %v2246_v47  ;;  %1555 = vmatprep.subr.bf16.mxu1 %v2249_v48 }
 0x19a   : > { %1470 = vmatpush1.bf16.msra.mxu0 %v2244_v49  ;;  %1556 = vmatpush1.bf16.msra.mxu1 %v2247_v51 }
 0x19b   : > { %1471 = vmatprep.subr.bf16.mxu0 %v2252_v52  ;;  %1557 = vmatprep.subr.bf16.mxu1 %v2255_v53 }
 0x19e   : > { %1472 = vmatpush1.bf16.msra.mxu0 %v2250_v55  ;;  %1558 = vmatpush1.bf16.msra.mxu1 %v2253_v56 }
 0x19f   : > { %1473 = vmatprep.subr.bf16.mxu0 %v2258_v57  ;;  %1559 = vmatprep.subr.bf16.mxu1 %v2261_v32 }
 0x1a2   : > { %1474 = vmatpush1.bf16.msra.mxu0 %v2256_v58  ;;  %1560 = vmatpush1.bf16.msra.mxu1 %v2259_v37 }
 0x1a3   : > { %1475 = vmatprep.subr.bf16.mxu0 %v2264_v60  ;;  %1561 = vmatprep.subr.bf16.mxu1 %v2267_v61 }
 0x1a6   : > { %1476 = vmatpush1.bf16.msra.mxu0 %v2262_v34  ;;  %1562 = vmatpush1.bf16.msra.mxu1 %v2265_v62 }
 0x1a7   : > { %1477 = vmatprep.subr.bf16.mxu0 %v2270_v41  ;;  %1563 = vmatprep.subr.bf16.mxu1 %v2273_v63 }
 0x1aa   : > { %1478 = vmatpush1.bf16.msra.mxu0 %v2268_v1  ;;  %1564 = vmatpush1.bf16.msra.mxu1 %v2271_v2 }
 0x1ab   : > { %1479 = vmatprep.subr.bf16.mxu0 %v2276_v50  ;;  %1565 = vmatprep.subr.bf16.mxu1 %v2279_v3 }
 0x1ae   : > { %1480 = vmatpush1.bf16.msra.mxu0 %v2274_v54  ;;  %1566 = vmatpush1.bf16.msra.mxu1 %v2277_v59  ;;  %v1631_v59 = vld [vmem:[%s2823_s5] sm:$0xf] }
 0x1b1   : > { %1482 = vmatmul.mubr.bf16.vlgmr.msra.gmra.mrb[4].mxu0 %v2742_v7  ;;  %1568 = vmatmul.mubr.bf16.vlgmr.msra.gmra.mrb[4].mxu1 %v2742_v7 }
 0x284   : > { %v1483_v6 = vpop.f32.mrb[4].mxu0  ;;  %v1569_v9 = vpop.f32.mrb[4].mxu1 }
 0x285   : > { %v1974_v10 = vadd.f32 %v1483_v6, %v749_v5  ;;  %v1485_v11 = vpop.f32.mrb[5].mxu0  ;;  %v1571_v12 = vpop.f32.mrb[5].mxu1  ;;  %v1978_v19 = vadd.f32 %v1569_v9, %v757_v8  ;;  %v1644_v6 = vrot.slane %v1631_v59, %v2708_v29 }
 0x286   : > { %v1975_v13 = vadd.f32 %v1485_v11, %v753_v0  ;;  %v1487_v15 = vpop.f32.mrb[6].mxu0  ;;  %v1573_v7 = vpop.f32.mrb[6].mxu1  ;;  %v1979_v22 = vadd.f32 %v1571_v12, %v761_v14  ;;  %v1670_v11 = vrot.slane %v1661_v4, %v2704_v26  ;;  %v1674_v12 = vrot.slane %v1661_v4, %v2708_v29 }
 0x287   : > { %v1976_v16 = vadd.f32 %v1487_v15, %v749_v5  ;;  %v1489_v17 = vpop.f32.mrb[7].mxu0  ;;  %v1575_v18 = vpop.f32.mrb[7].mxu1  ;;  %v1980_v23 = vadd.f32 %v1573_v7, %v757_v8  ;;  %v1636_v5 = vrot.slane %v1631_v59, %v2699_v24  ;;  %v1648_v8 = vrot.slane %v1631_v59, %v2710_v31 }
 0x288   : > { %v1578_v20 = vadd.f32 %v1975_v13, %v1974_v10  ;;  %v1977_v21 = vadd.f32 %v1489_v17, %v753_v0  ;;  %v1981_v33 = vadd.f32 %v1575_v18, %v761_v14  ;;  %v1640_v0 = vrot.slane %v1631_v59, %v2704_v26 }
 0x28a   : > { %v1583_v25 = vadd.f32 %v1977_v21, %v1976_v16  ;;  %v1579_v27 = vadd.f32 %v1978_v19, %v1578_v20 }
 0x28c   : > { %v1580_v28 = vadd.f32 %v1979_v22, %v1579_v27  ;;  %v1584_v30 = vadd.f32 %v1980_v23, %v1583_v25 }
 0x28e   : > { %1581 = vadd.xlane.f32.xlu0 %v1580_v28  ;;  %v1585_v35 = vadd.f32 %v1981_v33, %v1584_v30 }
 0x292   : > { %1586 = vadd.xlane.f32.xlu0 %v1585_v35 }
 0x31b   : > { %v1582_v36 = vpop.xlane.xlu0 %1581 }
 0x31c   : > { %v1589_v38 = vmul.f32 0.001953125, %v1582_v36 }
 0x31e   : > { %v1591_v39 = vsub.f32 %v1974_v10, %v1589_v38  ;;  %v1592_v40 = vsub.f32 %v1975_v13, %v1589_v38  ;;  %v1593_v42 = vsub.f32 %v1978_v19, %v1589_v38  ;;  %v1594_v44 = vsub.f32 %v1979_v22, %v1589_v38 }
 0x31f   : > { %v1587_v43 = vpop.xlane.xlu0 %1586  ;;  %v1666_v10 = vrot.slane %v1661_v4, %v2699_v24  ;;  %v1678_v13 = vrot.slane %v1661_v4, %v2710_v31 }
 0x320   : > { %v1590_v45 = vmul.f32 0.001953125, %v1587_v43  ;;  %v1599_v46 = vmul.f32 %v1591_v39, %v1591_v39  ;;  %v1600_v47 = vmul.f32 %v1592_v40, %v1592_v40  ;;  %v1601_v48 = vmul.f32 %v1593_v42, %v1593_v42 }
 0x321   : > { %v1602_v55 = vmul.f32 %v1594_v44, %v1594_v44 }
 0x322   : > { %v1595_v49 = vsub.f32 %v1976_v16, %v1590_v45  ;;  %v1596_v51 = vsub.f32 %v1977_v21, %v1590_v45  ;;  %v1607_v52 = vadd.f32 %v1600_v47, %v1599_v46  ;;  %v1597_v53 = vsub.f32 %v1980_v23, %v1590_v45 }
 0x323   : > { %v1598_v57 = vsub.f32 %v1981_v33, %v1590_v45 }
 0x324   : > { %v1608_v56 = vadd.f32 %v1607_v52, %v1601_v48  ;;  %v1603_v32 = vmul.f32 %v1595_v49, %v1595_v49  ;;  %v1604_v58 = vmul.f32 %v1596_v51, %v1596_v51  ;;  %v1605_v60 = vmul.f32 %v1597_v53, %v1597_v53 }
 0x325   : > { %v1606_v34 = vmul.f32 %v1598_v57, %v1598_v57 }
 0x326   : > { %v1609_v37 = vadd.f32 %v1608_v56, %v1602_v55  ;;  %v1612_v61 = vadd.f32 %v1604_v58, %v1603_v32 }
 0x328   : > { %1610 = vadd.xlane.f32.xlu1 %v1609_v37  ;;  %v1613_v62 = vadd.f32 %v1612_v61, %v1605_v60 }
 0x32a   : > { %v1614_v41 = vadd.f32 %v1613_v62, %v1606_v34 }
 0x32c   : > { %1615 = vadd.xlane.f32.xlu1 %v1614_v41 }
 0x3b5   : > { %v1611_v63 = vpop.xlane.xlu1 %1610 }
 0x3b6   : > { %v1617_v1 = vmul.f32 0.001953125, %v1611_v63 }
 0x3b8   : > { %v1619_v2 = vadd.f32 1e-05, %v1617_v1 }
 0x3b9   : > { %v1616_v50 = vpop.xlane.xlu1 %1615 }
 0x3ba   : > { %2296 = vrsqrt.f32 %v1619_v2  ;;  %v1618_v3 = vmul.f32 0.001953125, %v1616_v50 }
 0x3bc   : > { %v1620_v54 = vadd.f32 1e-05, %v1618_v3 }
 0x3be   : > { %2298 = vrsqrt.f32 %v1620_v54 }
 0x3c4   : > { %v2297_v9 = vpop.eup %2296 }
 0x3c5   : > { %v1623_v14 = vmul.f32 %v2297_v9, %v1591_v39  ;;  %v1624_v15 = vmul.f32 %v2297_v9, %v1592_v40  ;;  %v1625_v7 = vmul.f32 %v2297_v9, %v1593_v42  ;;  %v1626_v16 = vmul.f32 %v2297_v9, %v1594_v44 }
 0x3c7   : > { %v1653_v17 = vmul.f32 %v1636_v5, %v1623_v14  ;;  %v1654_v18 = vmul.f32 %v1640_v0, %v1624_v15  ;;  %v1655_v19 = vmul.f32 %v1644_v6, %v1625_v7  ;;  %v1656_v20 = vmul.f32 %v1648_v8, %v1626_v16 }
 0x3c8   : > { %v2299_v21 = vpop.eup %2298 }
 0x3c9   : > { %v1683_v22 = vadd.f32 %v1666_v10, %v1653_v17  ;;  %v1684_v23 = vadd.f32 %v1670_v11, %v1654_v18  ;;  %v1685_v24 = vadd.f32 %v1674_v12, %v1655_v19  ;;  %v1686_v25 = vadd.f32 %v1678_v13, %v1656_v20 }
 0x3ca   : > { %v1627_v26 = vmul.f32 %v2299_v21, %v1595_v49  ;;  %v1628_v27 = vmul.f32 %v2299_v21, %v1596_v51  ;;  %v1629_v29 = vmul.f32 %v2299_v21, %v1597_v53  ;;  %v1630_v28 = vmul.f32 %v2299_v21, %v1598_v57 }
 0x3cb   : > { %1691 = vst [vmem:[%s325_s29] sm:$0xff] %v1683_v22  ;;  %1692 = vst [vmem:[%s325_s29 + $0x8] sm:$0xff] %v1684_v23 }
 0x3cc   : > { %1693 = vst [vmem:[%s325_s29 + $0x10] sm:$0xff] %v1685_v24  ;;  %1694 = vst [vmem:[%s325_s29 + $0x18] sm:$0xff] %v1686_v25  ;;  %v1657_v31 = vmul.f32 %v1636_v5, %v1627_v26  ;;  %v1658_v30 = vmul.f32 %v1640_v0, %v1628_v27  ;;  %v1659_v33 = vmul.f32 %v1644_v6, %v1629_v29 }
 0x3cd   : > { %v1660_v35 = vmul.f32 %v1648_v8, %v1630_v28 }
 0x3ce   : > { %v1687_v36 = vadd.f32 %v1666_v10, %v1657_v31  ;;  %v1688_v38 = vadd.f32 %v1670_v11, %v1658_v30  ;;  %v1689_v39 = vadd.f32 %v1674_v12, %v1659_v33 }
 0x3cf   : > { %v1690_v40 = vadd.f32 %v1678_v13, %v1660_v35 }
 0x3d0   : > { %1695 = vst [vmem:[%s325_s29 + $0x20] sm:$0xff] %v1687_v36  ;;  %1696 = vst [vmem:[%s325_s29 + $0x28] sm:$0xff] %v1688_v38 }
 0x3d1   : > { %1697 = vst [vmem:[%s325_s29 + $0x30] sm:$0xff] %v1689_v39  ;;  %1698 = vst [vmem:[%s325_s29 + $0x38] sm:$0xff] %v1690_v40 }
 0x3d2   : > { %2399 = shalt.err (!%p2396_p2)
}
 0x3d3   : > { %s2400_s15 = scalar_lea.hbm %s2772_s9, 1024  ;;  %s2404_s14 = scalar_lea.hbm %s2825_s7, 2048 }
 0x3d4   : > { %p2401_p13 = scmp.ne.s32.totalorder %s2772_s9, %s2400_s15  ;;  %p2405_p4 = scmp.lt.u32.totalorder %s2772_s9, %s2825_s7 }
 0x3d5   : > { %p2406_p5 = scmp.lt.u32.totalorder %s2404_s14, %s2400_s15  ;;  %p2408_p11 = scmp.lt.u32.totalorder %s2400_s15, %s2772_s9 }
 0x3d6   : > { %p2402_p6 = pnand %p2401_p13, %p2839_p0 }
 0x3d7   : > { %p2407_p8 = por %p2406_p5, %p2405_p4 }
 0x3d8   : > { %p2403_p10 = pneg %p2402_p6 }
 0x3d9   : > { %p2409_p1 = por %p2408_p11, %p2407_p8 }
 0x3db   : > { %p2410_p3 = pnand %p2409_p1, %p2403_p10 }
 0x3dd   : > { %2413 = shalt.err (!%p2410_p3)
}
 0x3de   : > { %s2467_s30 = smov 512   ;;  %s2468_s20 = smov 32  }
 0x3df   : > { %2000 = dma.vmem_to_hbm [thread:$0]  (%p2839_p0), %s2774_s18, 1024, %s2772_s9, %s1700_s28, %s2467_s30, %s2467_s30, %s2468_s20  }
 0x3e0 PF: > { %s1729_s11 = sand.u32 1, %s2444_s24   ;;  %p2840_p7 = scmp.ne.s32.totalorder %s2830_s8, 0 }
 0x3e1   : > { %p2841_p9 = scmp.ge.s32.totalorder %s2456_s27, 2  ;;  %s1730_s22 = scalar_lea.sflag [#allocation4], %s1729_s11 }
 0x3e3   : > { %p2014_p12 = pnand %p2841_p9, %p2840_p7 }
 0x3e5   : > { %2439 = dma.done.wait (!%p2014_p12), %s1730_s22, 1024  }
 0x3e6   : > { %2441 = vsyncadd (!%p2014_p12), %s1730_s22, 4294966272  ;;  %p21_p2 = scmp.ge.s32.totalorder %s2619_s13, 4   ;;  %s2842_s24 = smov %s2448_s25 }
 0x3e7   : > { %s2843_s25 = smov %s2452_s26  ;;  %s2844_s26 = smov %s2635_s17 }
 0x3e8   : > { %s2845_s27 = smov %s2619_s13  ;;  %23 = sbr.rel (!%p21_p2) target bundleno = 6 (0x6), region = 101 }
 0x3ef   :  { %1735 = vsyncpa [#allocation3], 1 }
 0x3f0   :  { %1737 = vsyncpa [#allocation3 + $0x1], 1 }
 0x3f1   :  { %1738 = vsyncpa [#allocation6], 1 }
 0x3f2   :  { %1739 = vsyncpa [#allocation4], 1 }
 0x3f3   :  { %1741 = vsyncpa [#allocation4 + $0x1], 1 }

</bundles_post_ra>
